<compile_context>
chip_gen: v6e
topology: v6e:2x2x1
jax: 0.10.0
libtpu: 0.0.40
codegen_flags: <defaults>
</compile_context>

<pallas_src>
import functools

import jax
import jax.numpy as jnp
from jax import lax
from jax.experimental import pallas as pl
from jax.experimental.pallas import tpu as pltpu


def _tversky_sums_kernel(p_ref, t_ref, pt_ref, sp_ref, st_ref, *,
                         hw, tile, lane_w, needs_mask):
    k = pl.program_id(1)                      # spatial (reduction) axis, last
    last = pl.num_programs(1) - 1
    n_chunks = tile // lane_w

    @pl.when(k == 0)
    def _():
        pt_ref[...] = jnp.zeros_like(pt_ref)
        sp_ref[...] = jnp.zeros_like(sp_ref)
        st_ref[...] = jnp.zeros_like(st_ref)

    def _accum(masked):
        for c in range(n_chunks):             # static unroll; aligned 128-lane chunks
            lo = c * lane_w
            p = p_ref[:, lo:lo + lane_w].astype(jnp.float32)
            t = t_ref[:, lo:lo + lane_w].astype(jnp.float32)
            if masked:
                lane = lax.broadcasted_iota(jnp.int32, p.shape, 1)
                valid = (k * tile + lo + lane) < hw
                p = jnp.where(valid, p, 0.0)
                t = jnp.where(valid, t, 0.0)
            pt_ref[...] += p * t               # pure VALU adds into lane-dense
            sp_ref[...] += p                   # accumulators: no XLU reduce,
            st_ref[...] += t                   # no width-1 masked stores.

    if needs_mask:
        # Only the last spatial block overhangs; keep the steady state mask-free.
        @pl.when(k != last)
        def _():
            _accum(False)

        @pl.when(k == last)
        def _():
            _accum(True)
    else:
        _accum(False)


def _vmem_capacity_bytes():
    try:
        info = pltpu.get_tpu_info()
        cap = getattr(info, "vmem_capacity_bytes", None)
        if cap:
            return int(cap)
    except Exception:
        pass
    return 64 * 1024 * 1024   # conservative default (v7x-sized)


def _normalize_dtype(x):
    if x.dtype == jnp.float16:
        # f16 vector load/cast support is spotty; bf16 keeps 2 B/elem in HBM.
        return x.astype(jnp.bfloat16)
    if not jnp.issubdtype(x.dtype, jnp.floating):
        return x.astype(jnp.float32)
    if x.dtype == jnp.float64:
        return x.astype(jnp.float32)
    return x


def _pick_fold(nc, hw, *, min_rows=16, target_rows=128, max_rows=2048):
    """Spatial->row fold factor S (S | hw): (nc, hw) -> (nc*S, hw//S)."""
    if nc % 8 == 0 and nc >= min_rows:
        return 1                                  # already well shaped
    if hw <= 128:
        return 1
    lane_floor = 512 if hw >= 1024 else 128       # keep folded rows lane-dense
    cands = [s for s in range(1, hw // lane_floor + 1)
             if hw % s == 0 and nc * s <= max_rows]
    if not cands:
        return 1
    good = [s for s in cands if (nc * s) % 8 == 0 and nc * s >= min_rows]
    if good:
        reach = [s for s in good if nc * s >= target_rows]
        return min(reach) if reach else max(good)
    ok8 = [s for s in cands if (nc * s) % 8 == 0]
    return max(ok8) if ok8 else 1


def _pick_row_tile(rows, max_rows=256):
    if rows % 8 != 0:
        return rows                               # full dim (exempt from 8-rule)
    # Cap at rows//2 so the 'parallel' row axis has >=2 blocks (v7x megacore).
    cap = min(max_rows, rows // 2 if rows >= 16 else rows)
    cap = max(cap, 8)
    cands = [d for d in range(8, cap + 1, 8) if rows % d == 0]
    return max(cands) if cands else rows


def _pick_spatial_tile(hw, row_tile, itemsize, vmem_cap):
    if hw <= 128:
        return hw
    # Per-input block budget: HBM roofline saturates well below this, and
    # 3-deep buffering of both inputs must stay comfortably inside VMEM.
    per_block = max(512 * 1024, min(4 << 20, vmem_cap // 16))
    lanes = per_block // max(1, row_tile * itemsize)
    lanes = (lanes // 128) * 128
    lanes = max(128, min(lanes, 8192))            # 8192 bounds the unrolled fold
    lanes = min(lanes, (hw // 128) * 128)         # never exceed the array extent
    return lanes


def _input_spec(row_tile, tile, n_buf):
    index_map = lambda i, k: (i, k)
    if n_buf > 2:
        try:
            return pl.BlockSpec((row_tile, tile), index_map,
                                pipeline_mode=pl.Buffered(n_buf))
        except Exception:
            pass
    return pl.BlockSpec((row_tile, tile), index_map)


def tversky_loss(preds, targets, *, alpha=0.5, beta=0.5, smooth=1.0,
                 reduction="mean", spatial_tile=None, max_row_tile=256):
    """Matches gcpds_cv_pykit TverskyLoss.forward on (N, C, H, W) inputs."""
    if reduction not in ("mean", "sum", "none"):
        raise ValueError(f"Invalid reduction: {reduction}")
    alpha, beta, smooth = float(alpha), float(beta), float(smooth)

    preds = _normalize_dtype(preds)
    targets = _normalize_dtype(targets)

    N, C = preds.shape[:2]
    hw = 1
    for d in preds.shape[2:]:
        hw *= d
    nc = N * C

    # Fold a spatial factor into the row dim when N*C is small / ragged
    # (contiguous reshape -> no HBM copy); partial rows are recombined below.
    fold = _pick_fold(nc, hw)
    rows, hw_f = nc * fold, hw // fold
    p = preds.reshape(rows, hw_f)
    t = targets.reshape(rows, hw_f)

    row_tile = _pick_row_tile(rows, max_row_tile)
    vmem_cap = _vmem_capacity_bytes()
    max_item = max(p.dtype.itemsize, t.dtype.itemsize)
    if hw_f <= 128:
        tile = hw_f
    elif spatial_tile is None:
        tile = _pick_spatial_tile(hw_f, row_tile, max_item, vmem_cap)
    else:
        tile = max(128, (int(spatial_tile) // 128) * 128)
        tile = min(tile, (hw_f // 128) * 128)
    lane_w = min(tile, 128)

    n_row = -(-rows // row_tile)
    n_spatial = -(-hw_f // tile)
    needs_mask = (hw_f % tile) != 0
    n_buf = 3 if n_spatial >= 3 else 2            # 3-deep hides DMA re-issue gap

    in_block = row_tile * tile * (p.dtype.itemsize + t.dtype.itemsize)
    out_block = 3 * row_tile * lane_w * 4
    vmem_limit = int(min(0.9 * vmem_cap,
                         max(32 << 20,
                             n_buf * in_block + 2 * out_block + (8 << 20))))

    cost = pl.CostEstimate(
        flops=4 * rows * hw_f,
        transcendentals=0,
        bytes_accessed=rows * hw_f * (p.dtype.itemsize + t.dtype.itemsize)
        + 3 * rows * lane_w * 4,
    )

    kernel = functools.partial(
        _tversky_sums_kernel, hw=hw_f, tile=tile, lane_w=lane_w,
        needs_mask=needs_mask)

    acc_shape = jax.ShapeDtypeStruct((rows, lane_w), jnp.float32)
    acc_spec = pl.BlockSpec((row_tile, lane_w), lambda i, k: (i, 0))

    out_pt, out_p, out_t = pl.pallas_call(
        kernel,
        out_shape=(acc_shape, acc_shape, acc_shape),
        grid_spec=pltpu.PrefetchScalarGridSpec(
            num_scalar_prefetch=0,
            grid=(n_row, n_spatial),
            in_specs=[_input_spec(row_tile, tile, n_buf),
                      _input_spec(row_tile, tile, n_buf)],
            out_specs=[acc_spec, acc_spec, acc_spec],
        ),
        compiler_params=pltpu.CompilerParams(
            dimension_semantics=("parallel", "arbitrary"),
            vmem_limit_bytes=vmem_limit,
        ),
        cost_estimate=cost,
    )(p, t)

    # Tiny epilogue: cross-lane / cross-fold reduce and the Tversky formula.
    tp = out_pt.reshape(N, C, -1).sum(axis=-1)
    sp = out_p.reshape(N, C, -1).sum(axis=-1)
    st = out_t.reshape(N, C, -1).sum(axis=-1)
    fp = sp - tp
    fn = st - tp
    tversky = (tp + smooth) / (tp + alpha * fp + beta * fn + smooth)
    loss = 1.0 - tversky

    if reduction == "mean":
        return jnp.mean(loss)
    if reduction == "sum":
        return jnp.sum(loss)
    return loss


def _tversky_ref(preds, targets, alpha=0.5, beta=0.5, smooth=1.0,
                 reduction="mean"):
    preds = preds.astype(jnp.float32)
    targets = targets.astype(jnp.float32)
    N, C = preds.shape[:2]
    p = preds.reshape(N, C, -1)
    t = targets.reshape(N, C, -1)
    tp = jnp.sum(p * t, -1)
    fp = jnp.sum(p * (1 - t), -1)
    fn = jnp.sum((1 - p) * t, -1)
    tversky = (tp + smooth) / (tp + alpha * fp + beta * fn + smooth)
    loss = 1 - tversky
    if reduction == "mean":
        return jnp.mean(loss)
    if reduction == "sum":
        return jnp.sum(loss)
    return loss


if __name__ == "__main__":
    key = jax.random.PRNGKey(0)
    k1, k2 = jax.random.split(key)

    # 1) Standard shape, auto tiling (spatial->row fold: nc=8 -> 16 rows,
    #    two parallel row blocks), 'mean' reduction.
    N, C, H, W = 2, 4, 16, 16
    preds = jax.nn.sigmoid(jax.random.normal(k1, (N, C, H, W), jnp.float32))
    targets = (jax.random.uniform(k2, (N, C, H, W)) > 0.5).astype(jnp.float32)
    out = jax.block_until_ready(tversky_loss(preds, targets))
    ref = _tversky_ref(preds, targets)
    assert jnp.allclose(out, ref, atol=1e-5, rtol=1e-5), (out, ref)

    # 2) Spatial extent not a multiple of 128: multi-block reduction with the
    #    in-kernel tail mask on the overhanging last block, 'none' reduction.
    p2 = jax.nn.sigmoid(jax.random.normal(k1, (2, 4, 15, 15), jnp.float32))
    t2 = (jax.random.uniform(k2, (2, 4, 15, 15)) > 0.5).astype(jnp.float32)
    out2 = jax.block_until_ready(
        tversky_loss(p2, t2, reduction="none", spatial_tile=128))
    ref2 = _tversky_ref(p2, t2, reduction="none")
    assert jnp.allclose(out2, ref2, atol=1e-5, rtol=1e-5), (out2, ref2)

    # 3) bf16 preds (in-register upcast), >=3 spatial steps -> Buffered(3)
    #    input pipelining + multi-chunk lane fold, 'sum' reduction.
    p3 = jax.nn.sigmoid(jax.random.normal(k1, (2, 8, 32, 64), jnp.float32)
                        ).astype(jnp.bfloat16)
    t3 = (jax.random.uniform(k2, (2, 8, 32, 64)) > 0.5).astype(jnp.float32)
    out3 = jax.block_until_ready(
        tversky_loss(p3, t3, reduction="sum", spatial_tile=256))
    ref3 = _tversky_ref(p3, t3, reduction="sum")
    assert jnp.allclose(out3, ref3, atol=1e-4, rtol=1e-4), (out3, ref3)

    # 4) N*C not a multiple of 8: spatial->row fold restores sublane occupancy.
    p4 = jax.nn.sigmoid(jax.random.normal(k1, (1, 6, 16, 32), jnp.float32))
    t4 = (jax.random.uniform(k2, (1, 6, 16, 32)) > 0.5).astype(jnp.float32)
    out4 = jax.block_until_ready(tversky_loss(p4, t4, reduction="none"))
    ref4 = _tversky_ref(p4, t4, reduction="none")
    assert jnp.allclose(out4, ref4, atol=1e-5, rtol=1e-5), (out4, ref4)

    print("KERNEL_OK")
</pallas_src>

<mosaic_0001>
module attributes {stable_mosaic.version = 11 : i64} {
  func.func @_tversky_sums_kernel(%arg0: i32, %arg1: i32, %arg2: memref<8x128xf32, #tpu.memory_space<vmem>>, %arg3: memref<8x128xf32, #tpu.memory_space<vmem>>, %arg4: memref<8x128xf32, #tpu.memory_space<vmem>>, %arg5: memref<8x128xf32, #tpu.memory_space<vmem>>, %arg6: memref<8x128xf32, #tpu.memory_space<vmem>>) attributes {dimension_semantics = [#tpu.dimension_semantics<parallel>, #tpu.dimension_semantics<arbitrary>], iteration_bounds = array<i64: 2, 1>, scalar_prefetch = 0 : i64, scratch_operands = 0 : i64, tpu.core_type = #tpu.core_type<tc>, window_params = [{transform_indices = @transform_0, window_bounds = array<i64: 8, 128>}, {transform_indices = @transform_1, window_bounds = array<i64: 8, 128>}, {transform_indices = @transform_2, window_bounds = array<i64: 8, 128>}, {transform_indices = @transform_3, window_bounds = array<i64: 8, 128>}, {transform_indices = @transform_4, window_bounds = array<i64: 8, 128>}]} {
    %c0_i32 = arith.constant 0 : i32
    %0 = arith.cmpi eq, %arg1, %c0_i32 : i32
    %1 = arith.extui %0 : i1 to i32
    %c0_i32_0 = arith.constant 0 : i32
    %2 = arith.cmpi ne, %1, %c0_i32_0 : i32
    scf.if %2 {
      %cst = arith.constant 0.000000e+00 : f32
      %15 = vector.broadcast %cst : f32 to vector<8x128xf32>
      %c0_16 = arith.constant 0 : index
      %c0_17 = arith.constant 0 : index
      %16 = vector.load %arg4[%c0_16, %c0_17] : memref<8x128xf32, #tpu.memory_space<vmem>>, vector<8x128xf32>
      tpu.vector_store %arg4[%c0_16, %c0_17], %15 {strides = array<i32>} : memref<8x128xf32, #tpu.memory_space<vmem>>, vector<8x128xf32>,
      %cst_18 = arith.constant 0.000000e+00 : f32
      %17 = vector.broadcast %cst_18 : f32 to vector<8x128xf32>
      %c0_19 = arith.constant 0 : index
      %c0_20 = arith.constant 0 : index
      %18 = vector.load %arg5[%c0_19, %c0_20] : memref<8x128xf32, #tpu.memory_space<vmem>>, vector<8x128xf32>
      tpu.vector_store %arg5[%c0_19, %c0_20], %17 {strides = array<i32>} : memref<8x128xf32, #tpu.memory_space<vmem>>, vector<8x128xf32>,
      %cst_21 = arith.constant 0.000000e+00 : f32
      %19 = vector.broadcast %cst_21 : f32 to vector<8x128xf32>
      %c0_22 = arith.constant 0 : index
      %c0_23 = arith.constant 0 : index
      %20 = vector.load %arg6[%c0_22, %c0_23] : memref<8x128xf32, #tpu.memory_space<vmem>>, vector<8x128xf32>
      tpu.vector_store %arg6[%c0_22, %c0_23], %19 {strides = array<i32>} : memref<8x128xf32, #tpu.memory_space<vmem>>, vector<8x128xf32>,
    } else {
    }
    %c0 = arith.constant 0 : index
    %c0_1 = arith.constant 0 : index
    %3 = vector.load %arg2[%c0, %c0_1] : memref<8x128xf32, #tpu.memory_space<vmem>>, vector<8x128xf32>
    %c0_2 = arith.constant 0 : index
    %c0_3 = arith.constant 0 : index
    %4 = vector.load %arg3[%c0_2, %c0_3] : memref<8x128xf32, #tpu.memory_space<vmem>>, vector<8x128xf32>
    %c0_4 = arith.constant 0 : index
    %c0_5 = arith.constant 0 : index
    %5 = vector.load %arg4[%c0_4, %c0_5] : memref<8x128xf32, #tpu.memory_space<vmem>>, vector<8x128xf32>
    %6 = arith.mulf %3, %4 : vector<8x128xf32>
    %7 = arith.addf %5, %6 : vector<8x128xf32>
    %c0_6 = arith.constant 0 : index
    %c0_7 = arith.constant 0 : index
    %8 = vector.load %arg4[%c0_6, %c0_7] : memref<8x128xf32, #tpu.memory_space<vmem>>, vector<8x128xf32>
    tpu.vector_store %arg4[%c0_6, %c0_7], %7 {strides = array<i32>} : memref<8x128xf32, #tpu.memory_space<vmem>>, vector<8x128xf32>,
    %c0_8 = arith.constant 0 : index
    %c0_9 = arith.constant 0 : index
    %9 = vector.load %arg5[%c0_8, %c0_9] : memref<8x128xf32, #tpu.memory_space<vmem>>, vector<8x128xf32>
    %10 = arith.addf %9, %3 : vector<8x128xf32>
    %c0_10 = arith.constant 0 : index
    %c0_11 = arith.constant 0 : index
    %11 = vector.load %arg5[%c0_10, %c0_11] : memref<8x128xf32, #tpu.memory_space<vmem>>, vector<8x128xf32>
    tpu.vector_store %arg5[%c0_10, %c0_11], %10 {strides = array<i32>} : memref<8x128xf32, #tpu.memory_space<vmem>>, vector<8x128xf32>,
    %c0_12 = arith.constant 0 : index
    %c0_13 = arith.constant 0 : index
    %12 = vector.load %arg6[%c0_12, %c0_13] : memref<8x128xf32, #tpu.memory_space<vmem>>, vector<8x128xf32>
    %13 = arith.addf %12, %4 : vector<8x128xf32>
    %c0_14 = arith.constant 0 : index
    %c0_15 = arith.constant 0 : index
    %14 = vector.load %arg6[%c0_14, %c0_15] : memref<8x128xf32, #tpu.memory_space<vmem>>, vector<8x128xf32>
    tpu.vector_store %arg6[%c0_14, %c0_15], %13 {strides = array<i32>} : memref<8x128xf32, #tpu.memory_space<vmem>>, vector<8x128xf32>,
    return
  }
  func.func @transform_0(%arg0: i32, %arg1: i32) -> (i32, i32) {
    %c0_i32 = arith.constant 0 : i32
    return %arg0, %arg1 : i32, i32
  }
  func.func @transform_1(%arg0: i32, %arg1: i32) -> (i32, i32) {
    %c0_i32 = arith.constant 0 : i32
    return %arg0, %arg1 : i32, i32
  }
  func.func @transform_2(%arg0: i32, %arg1: i32) -> (i32, i32) {
    %c0_i32 = arith.constant 0 : i32
    %c0_i32_0 = arith.constant 0 : i32
    return %arg0, %c0_i32 : i32, i32
  }
  func.func @transform_3(%arg0: i32, %arg1: i32) -> (i32, i32) {
    %c0_i32 = arith.constant 0 : i32
    %c0_i32_0 = arith.constant 0 : i32
    return %arg0, %c0_i32 : i32, i32
  }
  func.func @transform_4(%arg0: i32, %arg1: i32) -> (i32, i32) {
    %c0_i32 = arith.constant 0 : i32
    %c0_i32_0 = arith.constant 0 : i32
    return %arg0, %c0_i32 : i32, i32
  }
}

</mosaic_0001>

<bundles_post_ra>
// kernel: tpu_custom_call.1
= control target key start
LH: loop header
LB: loop body
LE: loop exit
PB: predicated region body
PF: predicated region fallthrough
CT: control target
= control target key end

     0   :  { %s1098_s0 = inlined_call_operand.hbm [shape: f32[16,128], index: 0, kind: input, shape index: {}]   ;;  %s1099_s1 = inlined_call_operand.hbm [shape: f32[16,128], index: 1, kind: input, shape index: {}]   ;;  %s1100_s2 = inlined_call_operand.hbm [shape: f32[16,128], index: 2, kind: output, shape index: {0}]   ;;  %s1101_s3 = inlined_call_operand.hbm [shape: f32[16,128], index: 3, kind: output, shape index: {1}]   ;;  %s1102_s4 = inlined_call_operand.hbm [shape: f32[16,128], index: 4, kind: output, shape index: {2}]  }
   0x1   :  { %1105 = sst [smem:[#allocation15_spill]] %s1098_s0 }
   0x2   :  { %1106 = sst [smem:[#allocation16_spill]] %s1099_s1 }
   0x3   :  { %10 = vsyncpa [#allocation3], 0 }
   0x4   :  { %12 = vsyncpa [#allocation3 + $0x1], 0 }
   0x5   :  { %13 = vsyncpa [#allocation6], 0 }
   0x6   :  { %15 = vsyncpa [#allocation6 + $0x1], 0 }
   0x7   :  { %16 = vsyncpa [#allocation4], 0 }
   0x8   :  { %18 = vsyncpa [#allocation4 + $0x1], 0 }
   0x9   :  { %19 = vsyncpa [#allocation9], 0 }
   0xa   :  { %21 = vsyncpa [#allocation9 + $0x1], 0  ;;  %s847_s15 = smov 0   ;;  %s849_s16 = smov 0  }
   0xb   :  { %s851_s17 = smov 0   ;;  %s853_s18 = smov 0  }
   0xc   :  { %s855_s19 = smov 0   ;;  %s857_s20 = smov 0  }
   0xd LB: > { %s878_s21 = sadd.s32 4294967295, %s815_s20   ;;  %s1103_s22 = sadd.s32 4294967294, %s815_s20   ;;  %s815_s20 = sphi %s857_s20, %s27_s20   ;;  %s811_s19 = sphi %s855_s19, %s1122_s19   ;;  %s807_s18 = sphi %s853_s18, %s1121_s18   ;;  %s803_s17 = sphi %s851_s17, %s1120_s17   ;;  %s799_s16 = sphi %s849_s16, %s1119_s16   ;;  %s795_s15 = sphi %s847_s15, %s1118_s15  }
   0xe   : > { %s39_s23 = sadd.s32 1, %s811_s19  ;;  %s48_s24 = sadd.s32 1, %s803_s17 }
   0xf   : > { %p41_p0 = scmp.ge.s32.totalorder %s39_s23, 2  ;;  %p55_p1 = scmp.ne.s32.totalorder %s803_s17, %s799_s16 }
  0x10   : > { %p56_p2 = scmp.eq.s32.totalorder %s815_s20, 0  ;;  %p61_p3 = scmp.ne.s32.totalorder %s799_s16, %s795_s15 }
  0x11   : > { %s1124_s23 = smov (%p41_p0, %s39_s23), 0  ;;  %p62_p5 = scmp.eq.s32.totalorder %s878_s21, 0 }
  0x12   : > { %p890_p4 = por %p56_p2, %p55_p1  ;;  %s43_s26 = ssub.s32 %s811_s19, %s1124_s23 }
  0x13   : > { %p113_p6 = scmp.eq.s32.totalorder %s878_s21, 1  ;;  %p46_p7 = scmp.eq.s32.totalorder %s43_s26, 0 }
  0x14   : > { %p898_p8 = por %p62_p5, %p61_p3  ;;  %p119_p10 = scmp.eq.s32.totalorder %s1103_s22, 1 }
  0x15   : > { %p902_p9 = por %p113_p6, %p55_p1  ;;  %p568_p13 = scmp.lt.s32.totalorder %s815_s20, 2 }
  0x16   : > { %s909_s29 = scalar_select %p46_p7, %s803_s17, %s48_s24  }
  0x17   : > { %p911_p11 = por %p119_p10, %p61_p3  ;;  %s918_s5 = sand.u32 1, %s803_s17  }
  0x18   : > { %s523_s6 = sshll.u32 %s918_s5, 3  ;;  %s524_s7 = sshll.u32 %s811_s19, 7 }
  0x19   : > { %s1111_s0 = sld [smem:[#allocation15_spill]]  ;;  %s195_s11 = scalar_lea.vmem [#allocation2], %s523_s6 }
  0x1a   : > { %s203_s12 = sshll.u32 %s195_s11, 4  ;;  %p927_p0 = pnand %p568_p13, %p890_p4  ;;  %s204_s12 = int_to_ptr.vmem [resolvable:$true] %s203_s12 }
  0x1b   : > { %p527_p1 = scmp.ge.s32.totalorder %s815_s20, 1  ;;  %p227_p2 = scmp.lt.s32.totalorder %s815_s20, 3 }
  0x1c   : > { %s192_s14 = scalar_lea.sflag [#allocation3], %s918_s5  ;;  %p621_p3 = pneg %p927_p0 }
  0x1d   : > { %s632_s24 = scalar_lea.vmem %s204_s12, 128  ;;  %s817_s26 = smov [#allocation2]  }
  0x1e   : > { %p633_p5 = scmp.ne.s32.totalorder %s204_s12, %s632_s24  ;;  %s637_s8 = sshll.u32 %s817_s26, 4  ;;  %s638_s8 = int_to_ptr.vmem [resolvable:$false] %s637_s8 }
  0x1f   : > { %s201_s10 = scalar_lea.hbm %s1111_s0, %s524_s7  ;;  %s639_s25 = scalar_lea.vmem %s638_s8, 256 }
  0x20   : > { %p635_p6 = pnand %p633_p5, %p621_p3  ;;  %p640_p4 = scmp.lt.s32.totalorder %s204_s12, %s638_s8 }
  0x21   : > { %p641_p10 = scmp.lt.s32.totalorder %s639_s25, %s632_s24 }
  0x22   : > { %p636_p7 = pneg %p635_p6 }
  0x23   : > { %p642_p13 = por %p641_p10, %p640_p4 }
  0x25   : > { %p643_p12 = pnand %p642_p13, %p636_p7 }
  0x27   : > { %646 = shalt.err (!%p643_p12)
}
  0x28   : > { %554 = dma.hbm_to_vmem [thread:$0]  (!%p927_p0), %s201_s10, 128, %s204_s12, %s192_s14  }
  0x29   : > { %p945_p5 = pnand %p527_p1, %p227_p2  ;;  %s1114_s1 = sld [smem:[#allocation16_spill]] }
  0x2a   : > { %s214_s8 = scalar_lea.vmem [#allocation5], %s523_s6  ;;  %s211_s22 = scalar_lea.sflag [#allocation6], %s918_s5 }
  0x2b   : > { %s222_s25 = sshll.u32 %s214_s8, 4  ;;  %s818_s10 = smov [#allocation5]   ;;  %s223_s25 = int_to_ptr.vmem [resolvable:$true] %s222_s25 }
  0x2c   : > { %s660_s0 = scalar_lea.vmem %s223_s25, 128  ;;  %s665_s12 = sshll.u32 %s818_s10, 4  ;;  %s666_s12 = int_to_ptr.vmem [resolvable:$false] %s665_s12 }
  0x2d   : > { %p661_p12 = scmp.ne.s32.totalorder %s223_s25, %s660_s0  ;;  %s667_s14 = scalar_lea.vmem %s666_s12, 256 }
  0x2e   : > { %p668_p1 = scmp.lt.s32.totalorder %s223_s25, %s666_s12  ;;  %p669_p2 = scmp.lt.s32.totalorder %s667_s14, %s660_s0 }
  0x2f   : > { %s220_s24 = scalar_lea.hbm %s1114_s1, %s524_s7  ;;  %p663_p6 = pnand %p661_p12, %p621_p3 }
  0x30   : > { %p670_p4 = por %p669_p2, %p668_p1 }
  0x31   : > { %p664_p7 = pneg %p663_p6 }
  0x33   : > { %p671_p10 = pnand %p670_p4, %p664_p7 }
  0x35   : > { %674 = shalt.err (!%p671_p10)
}
  0x36   : > { %557 = dma.hbm_to_vmem [thread:$0]  (!%p927_p0), %s220_s24, 128, %s223_s25, %s211_s22  }
  0x37   : > { %231 = sbr.rel (%p945_p5) target bundleno = 134 (0x86), region = 28  ;;  %s961_s5 = sand.u32 (!%p945_p5), 1, %s799_s16  }
  0x38   : > { %s964_s6 = sshll.u32 (!%p945_p5), %s961_s5, 3  ;;  %s234_s7 = scalar_lea.sflag (!%p945_p5), [#allocation3], %s961_s5 }
  0x39   : > { %s237_s0 = scalar_lea.vmem (!%p945_p5), [#allocation2], %s964_s6 }
  0x3c   : > { %778 = dma.done.wait (%p898_p8), %s234_s7, 128  }
  0x3d   : > { %780 = vsyncadd (%p898_p8), %s234_s7, 4294967168  ;;  %s243_s22 = scalar_lea.sflag [#allocation6], %s961_s5  ;;  %s246_s13 = scalar_lea.vmem [#allocation5], %s964_s6 }
  0x3e   : > { %782 = dma.done.wait (%p898_p8), %s243_s22, 128  }
  0x3f   : > { %784 = vsyncadd (%p898_p8), %s243_s22, 4294967168  ;;  %s310_s9 = sand.u32 1, %s878_s21   ;;  %s285_s11 = scalar_lea.vmem [#allocation10], %s964_s6  ;;  %v293_v0 = vld [vmem:[%s237_s0] sm:$0xff]  ;;  %v294_v1 = vld [vmem:[%s246_s13] sm:$0xff] }
  0x40   : > { %s355_s26 = sshll.u32 %s285_s11, 4  ;;  %s536_s24 = sshll.u32 %s807_s18, 7  ;;  %v296_v2 = vmul.f32 %v294_v1, %v293_v0  ;;  %304 = vst [vmem:[%s285_s11] sm:$0xff] %v294_v1  ;;  %s982_s26 = int_to_ptr.vmem [resolvable:$true] %s355_s26 }
  0x41   : > { %s278_s8 = scalar_lea.vmem [#allocation8], %s964_s6  ;;  %s1104_s10 = scalar_lea.vmem [#allocation7], %s964_s6 }
  0x42   : > { %s342_s25 = sshll.u32 %s278_s8, 4  ;;  %s329_s27 = sshll.u32 %s1104_s10, 4  ;;  %301 = vst [vmem:[%s278_s8] sm:$0xff] %v293_v0  ;;  %s992_s25 = int_to_ptr.vmem [resolvable:$true] %s342_s25  ;;  %s1004_s27 = int_to_ptr.vmem [resolvable:$true] %s329_s27 }
  0x43   : > { %s990_s7 = scalar_lea.hbm %s1101_s3, %s536_s24  ;;  %s997_s22 = scalar_lea.hbm %s1102_s4, %s536_s24 }
  0x44   : > { %s1002_s10 = scalar_lea.hbm %s1100_s2, %s536_s24  ;;  %s1006_s12 = scalar_lea.sflag [#allocation9], %s310_s9 }
  0x45   : > { %s675_s14 = scalar_lea.vmem %s992_s25, 128  ;;  %s819_s21 = smov [#allocation8]  }
  0x46   : > { %p676_p8 = scmp.ne.s32.totalorder %s992_s25, %s675_s14  ;;  %s679_s18 = sshll.u32 %s819_s21, 4  ;;  %s680_s18 = int_to_ptr.vmem [resolvable:$false] %s679_s18 }
  0x47   : > { %s681_s1 = scalar_lea.vmem %s680_s18, 256  ;;  %p682_p13 = scmp.lt.s32.totalorder %s992_s25, %s680_s18 }
  0x48   : > { %p677_p0 = pnand %p676_p8, %p902_p9  ;;  %p683_p5 = scmp.lt.s32.totalorder %s681_s1, %s675_s14 }
  0x4a   : > { %p678_p3 = pneg %p677_p0  ;;  %p684_p12 = por %p683_p5, %p682_p13 }
  0x4c   : > { %p685_p6 = pnand %p684_p12, %p678_p3 }
  0x4e   : > { %688 = shalt.err (!%p685_p6)
}
  0x4f   : > { %s689_s9 = scalar_lea.hbm %s990_s7, 128  ;;  %s693_s8 = scalar_lea.hbm %s1101_s3, 256 }
  0x50   : > { %p690_p7 = scmp.ne.s32.totalorder %s990_s7, %s689_s9  ;;  %p694_p4 = scmp.lt.s32.totalorder %s990_s7, %s1101_s3 }
  0x51   : > { %p695_p10 = scmp.lt.s32.totalorder %s693_s8, %s689_s9 }
  0x52   : > { %p691_p1 = pnand %p690_p7, %p902_p9 }
  0x53   : > { %p696_p8 = por %p695_p10, %p694_p4 }
  0x54   : > { %p692_p2 = pneg %p691_p1 }
  0x56   : > { %p697_p0 = pnand %p696_p8, %p692_p2 }
  0x58   : > { %700 = shalt.err (!%p697_p0)
}
  0x59   : > { %546 = dma.vmem_to_hbm [thread:$0]  (%p902_p9), %s992_s25, 128, %s990_s7, %s1006_s12  }
  0x5a   : > { %s1115_s1 = scalar_lea.vmem [#allocation7], %s964_s6  ;;  %s701_s14 = scalar_lea.vmem %s982_s26, 128 }
  0x5b   : > { %298 = vst [vmem:[%s1115_s1] sm:$0xff] %v296_v2  ;;  %p702_p3 = scmp.ne.s32.totalorder %s982_s26, %s701_s14  ;;  %s820_s21 = smov [#allocation10]  }
  0x5c   : > { %s705_s18 = sshll.u32 %s820_s21, 4  ;;  %s706_s18 = int_to_ptr.vmem [resolvable:$false] %s705_s18 }
  0x5d   : > { %p703_p13 = pnand %p702_p3, %p902_p9  ;;  %s707_s9 = scalar_lea.vmem %s706_s18, 256 }
  0x5e   : > { %p708_p12 = scmp.lt.s32.totalorder %s982_s26, %s706_s18  ;;  %p709_p6 = scmp.lt.s32.totalorder %s707_s9, %s701_s14 }
  0x5f   : > { %p704_p5 = pneg %p703_p13 }
  0x60   : > { %p710_p7 = por %p709_p6, %p708_p12 }
  0x62   : > { %p711_p1 = pnand %p710_p7, %p704_p5 }
  0x64   : > { %714 = shalt.err (!%p711_p1)
}
  0x65   : > { %s715_s6 = scalar_lea.hbm %s997_s22, 128  ;;  %s719_s11 = scalar_lea.hbm %s1102_s4, 256 }
  0x66   : > { %p716_p2 = scmp.ne.s32.totalorder %s997_s22, %s715_s6  ;;  %p720_p8 = scmp.lt.s32.totalorder %s997_s22, %s1102_s4 }
  0x67   : > { %p721_p0 = scmp.lt.s32.totalorder %s719_s11, %s715_s6 }
  0x68   : > { %p717_p4 = pnand %p716_p2, %p902_p9 }
  0x69   : > { %p722_p3 = por %p721_p0, %p720_p8 }
  0x6a   : > { %p718_p10 = pneg %p717_p4 }
  0x6c   : > { %p723_p13 = pnand %p722_p3, %p718_p10 }
  0x6e   : > { %726 = shalt.err (!%p723_p13)
}
  0x6f   : > { %547 = dma.vmem_to_hbm [thread:$0]  (%p902_p9), %s982_s26, 128, %s997_s22, %s1006_s12  }
  0x70   : > { %s306_s0 = scalar_lea.sflag [#allocation4], %s961_s5  ;;  %s727_s13 = scalar_lea.vmem %s1004_s27, 128 }
  0x71   : > { %p728_p5 = scmp.ne.s32.totalorder %s1004_s27, %s727_s13  ;;  %s821_s1 = smov [#allocation7]  }
  0x72   : > { %s731_s14 = sshll.u32 %s821_s1, 4  ;;  %s732_s14 = int_to_ptr.vmem [resolvable:$false] %s731_s14 }
  0x73   : > { %p729_p12 = pnand %p728_p5, %p902_p9  ;;  %s733_s21 = scalar_lea.vmem %s732_s14, 256 }
  0x74   : > { %p734_p7 = scmp.lt.s32.totalorder %s1004_s27, %s732_s14  ;;  %p735_p1 = scmp.lt.s32.totalorder %s733_s21, %s727_s13 }
  0x75   : > { %p730_p6 = pneg %p729_p12 }
  0x76   : > { %p736_p2 = por %p735_p1, %p734_p7 }
  0x78   : > { %p737_p4 = pnand %p736_p2, %p730_p6 }
  0x7a   : > { %740 = shalt.err (!%p737_p4)
}
  0x7b   : > { %s741_s26 = scalar_lea.hbm %s1002_s10, 128  ;;  %s745_s12 = scalar_lea.hbm %s1100_s2, 256 }
  0x7c   : > { %p742_p10 = scmp.ne.s32.totalorder %s1002_s10, %s741_s26  ;;  %p746_p3 = scmp.lt.s32.totalorder %s1002_s10, %s1100_s2 }
  0x7d   : > { %p747_p13 = scmp.lt.s32.totalorder %s745_s12, %s741_s26 }
  0x7e   : > { %p743_p8 = pnand %p742_p10, %p902_p9 }
  0x7f   : > { %p748_p5 = por %p747_p13, %p746_p3 }
  0x80   : > { %p744_p0 = pneg %p743_p8 }
  0x82   : > { %p749_p12 = pnand %p748_p5, %p744_p0 }
  0x84   : > { %752 = shalt.err (!%p749_p12)
}
  0x85   : > { %545 = dma.vmem_to_hbm [thread:$0]  (%p902_p9), %s1004_s27, 128, %s1002_s10, %s306_s0  }
  0x86 PF: > { %s367_s6 = sand.u32 1, %s795_s15   ;;  %p1116_p6 = scmp.ge.s32.totalorder %s815_s20, 2 }
  0x87   : > { %s368_s25 = scalar_lea.sflag [#allocation4], %s367_s6 }
  0x88   : > { %p559_p7 = pnand %p1116_p6, %p911_p11 }
  0x8a   : > { %p560_p1 = pneg %p559_p7 }
  0x8c   : > { %786 = dma.done.wait (%p560_p1), %s368_s25, 128  }
  0x8d   : > { %788 = vsyncadd (%p560_p1), %s368_s25, 4294967168  ;;  %s1117_s7 = sadd.s32 4294967294, %s815_s20  }
  0x8e   : > { %s376_s11 = sand.u32 1, %s1117_s7  }
  0x8f   : > { %s377_s24 = scalar_lea.sflag [#allocation9], %s376_s11 }
  0x90   : > { %790 = dma.done.wait (%p560_p1), %s377_s24, 256  }
  0x91   : > { %792 = vsyncadd (%p560_p1), %s377_s24, 4294967040  ;;  %s27_s20 = sadd.s32 1, %s815_s20   ;;  %s1118_s15 = smov %s799_s16 }
  0x92   : > { %p24_p9 = scmp.ge.s32.totalorder %s27_s20, 4   ;;  %s1119_s16 = smov %s803_s17 }
  0x93   : > { %s1120_s17 = smov %s909_s29  ;;  %s1121_s18 = smov %s811_s19 }
  0x94   : > { %s1122_s19 = smov %s1124_s23  ;;  %26 = sbr.rel (!%p24_p9) target bundleno = 13 (0xd), region = 122 }
  0x99   :  { %391 = vsyncpa [#allocation3], 1 }
  0x9a   :  { %393 = vsyncpa [#allocation3 + $0x1], 1 }
  0x9b   :  { %394 = vsyncpa [#allocation6], 1 }
  0x9c   :  { %396 = vsyncpa [#allocation6 + $0x1], 1 }
  0x9d   :  { %397 = vsyncpa [#allocation4], 1 }
  0x9e   :  { %399 = vsyncpa [#allocation4 + $0x1], 1 }
  0x9f   :  { %400 = vsyncpa [#allocation9], 1 }
  0xa0   :  { %402 = vsyncpa [#allocation9 + $0x1], 1 }

</bundles_post_ra>
